<compile_context>
chip_gen: v7x
topology: tpu7x:2x2x1
jax: 0.10.0
libtpu: 0.0.40
codegen_flags: <defaults>
</compile_context>

<pallas_src>
import math

import jax
import jax.numpy as jnp
import numpy as np
from jax.experimental import pallas as pl
from jax.experimental.pallas import tpu as pltpu

_MB = 1024 * 1024


# --------------------------------------------------------------------------
# Kernels
# --------------------------------------------------------------------------
def _ffn_kernel_resident(x_ref, wp_ref, bp_ref, wg_ref, bg_ref, w2_ref, b2_ref,
                         o_ref):
    # Weights fully resident in VMEM (constant index_map -> DMA'd once).
    # x_ref : (TM, D)   wp/wg/w2 : (D, D)   bp/bg/b2 : (1, D)   o_ref : (TM, D)
    x = x_ref[...]
    proj = jnp.dot(x, wp_ref[...], preferred_element_type=jnp.float32)
    proj += bp_ref[...]
    gate = jnp.dot(x, wg_ref[...], preferred_element_type=jnp.float32)
    gate += bg_ref[...]
    h = proj * (gate * jax.nn.sigmoid(gate))              # SiLU gating (VPU/EUP)
    out = jnp.dot(h.astype(w2_ref.dtype), w2_ref[...],
                  preferred_element_type=jnp.float32)
    o_ref[...] = (out + b2_ref[...]).astype(o_ref.dtype)


def _ffn_kernel_ktiled(x_ref, wp_ref, bp_ref, wg_ref, bg_ref, w2_ref, b2_ref,
                       o_ref, acc_ref):
    # x_ref  : (TM, D)    wp_ref/wg_ref : (D, TK)   bp_ref/bg_ref : (1, TK)
    # w2_ref : (TK, D)    b2_ref        : (1, D)
    # o_ref  : (TM, D)    acc_ref       : (TM, D) f32 scratch
    k = pl.program_id(1)

    @pl.when(k == 0)
    def _init():
        # Fold b2 into the init so finalize is a pure cast+store.
        acc_ref[...] = jnp.broadcast_to(b2_ref[...], acc_ref.shape)

    x = x_ref[...]

    # Hidden-column tile of the SwiGLU projection (MXU, f32 accumulation).
    # b_proj / b_gate are per-hidden-column and k tiles are disjoint, so the
    # per-step bias add is correct (no double add).
    proj = jnp.dot(x, wp_ref[...], preferred_element_type=jnp.float32)
    proj += bp_ref[...]
    gate = jnp.dot(x, wg_ref[...], preferred_element_type=jnp.float32)
    gate += bg_ref[...]
    h = proj * (gate * jax.nn.sigmoid(gate))

    # Accumulate this hidden tile's contribution to the second linear.
    acc_ref[...] += jnp.dot(h.astype(w2_ref.dtype), w2_ref[...],
                            preferred_element_type=jnp.float32)

    @pl.when(k == pl.num_programs(1) - 1)
    def _finalize():
        o_ref[...] = acc_ref[...].astype(o_ref.dtype)


# --------------------------------------------------------------------------
# Tiling / VMEM budgeting
# --------------------------------------------------------------------------
def _cdiv(a, b):
    return -(-a // b)


def _round_up(x, m):
    return _cdiv(x, m) * m


def _device_vmem_budget():
    try:
        cap = int(pltpu.get_tpu_info().vmem_capacity_bytes)
    except Exception:
        cap = 64 * _MB  # conservative fallback = v7x per-TensorCore VMEM
    # Leave headroom for Mosaic internal scratch / semaphores.
    return cap * 7 // 8 - 4 * _MB


def _vmem_estimate(tm, tk, d_pad, n_k, wsize, osize):
    est = 2 * tm * d_pad * wsize            # x row tiles (double-buffered)
    est += 2 * 3 * d_pad * tk * wsize       # w_proj / w_gate / w2 tiles
    est += 2 * tm * d_pad * osize           # output tiles
    est += 3 * tm * tk * 4                  # proj / gate / h f32 temporaries
    est += tm * d_pad * 4                   # second-matmul f32 result
    if n_k > 1:
        est += tm * d_pad * 4               # f32 accumulator scratch
    est += 2 * (4 * tk + 2 * d_pad) * 4     # biases (tiny)
    return est


def _pick_tiles(m, d_pad, wsize, osize, budget, row_align, tm_target=512):
    """Pick (tm, tk). tk == d_pad selects the weight-resident (no-k-axis) path."""
    max_nm = max(1, _cdiv(m, row_align))
    # Weight-resident first, then hidden-column tiles. Prefer 256-multiples:
    # a 128-wide tile fills only half of v6e/v7x's 256-wide MXU.
    tk_cands = [d_pad] + [c for c in (1024, 768, 512, 384, 256, 128)
                          if c < d_pad and d_pad % c == 0]
    for tk in tk_cands:
        n_k = d_pad // tk
        # Row tiles: minimize padding (tm = ceil(m / n_m) rounded to the
        # sublane packing) and keep >= 2 tiles when m permits so the
        # "parallel" axis can shard across v7x's two TensorCores.
        n_m = 1 if m <= row_align else max(2, _cdiv(m, tm_target))
        while n_m <= max_nm:
            tm = _round_up(_cdiv(m, n_m), row_align)
            if _vmem_estimate(tm, tk, d_pad, n_k, wsize, osize) <= budget:
                return tm, tk
            n_m += 1
    # Last resort: smallest legal tiles (d_pad is always a multiple of 128).
    return row_align, 128


# --------------------------------------------------------------------------
# Wrapper
# --------------------------------------------------------------------------
def prepare_ffn_params(w1, b1, w2, b2, *, compute_dtype=jnp.bfloat16):
    """One-time (init-time) weight prep: split W1 into proj/gate halves,
    transpose PyTorch (out, in) layout to (in, out), pad feature dims to the
    128-lane tile and cast to the compute dtype (bf16 by default for MXU peak;
    pass jnp.float32 for an exact-semantics path)."""
    dim = w2.shape[0]
    d_pad = _round_up(dim, 128)
    cd = compute_dtype or w1.dtype

    w_proj = w1[:dim, :].T            # (dim, dim)  (in, out)
    w_gate = w1[dim:, :].T            # (dim, dim)
    w2_t = w2.T                       # (dim, dim)

    pad_w = ((0, d_pad - dim), (0, d_pad - dim))
    pad_b = ((0, 0), (0, d_pad - dim))
    return dict(
        dim=dim, d_pad=d_pad,
        w_proj=jnp.pad(w_proj, pad_w).astype(cd),
        w_gate=jnp.pad(w_gate, pad_w).astype(cd),
        w2=jnp.pad(w2_t, pad_w).astype(cd),
        b_proj=jnp.pad(b1[:dim].reshape(1, dim), pad_b).astype(jnp.float32),
        b_gate=jnp.pad(b1[dim:].reshape(1, dim), pad_b).astype(jnp.float32),
        b2=jnp.pad(b2.reshape(1, dim), pad_b).astype(jnp.float32),
    )


def feed_forward(x, params, *, vmem_budget_bytes=None):
    """x: (batch, seq, dim) -> (batch, seq, dim). params: prepare_ffn_params.
    vmem_budget_bytes overrides the tile-selection budget (testing only)."""
    batch, seq, dim = x.shape
    assert dim == params["dim"]
    d_pad = params["d_pad"]
    compute_dtype = params["w_proj"].dtype
    wsize = jnp.dtype(compute_dtype).itemsize
    osize = jnp.dtype(x.dtype).itemsize

    m = batch * seq
    device_budget = _device_vmem_budget()
    budget = vmem_budget_bytes or device_budget
    # Row alignment matches sublane packing of the compute dtype.
    row_align = {1: 32, 2: 16}.get(wsize, 8)
    tm, tk = _pick_tiles(m, d_pad, wsize, osize, budget, row_align)
    n_k = d_pad // tk
    m_pad = _round_up(m, tm)
    n_m = m_pad // tm

    x2d = x.reshape(m, dim)
    if (m_pad, d_pad) != (m, dim):
        x2d = jnp.pad(x2d, ((0, m_pad - m), (0, d_pad - dim)))
    x2d = x2d.astype(compute_dtype)

    est = _vmem_estimate(tm, tk, d_pad, n_k, wsize, osize)
    vmem_limit = min(device_budget, max(int(est * 1.25), 32 * _MB))

    # Resident weights (constant index_map) are DMA'd once; k-tiled weights
    # are re-streamed once per row tile.
    weight_reads = 1 if n_k == 1 else n_m
    cost = pl.CostEstimate(
        flops=6 * m * dim * dim,                  # 3 matmuls of (m,dim)x(dim,dim)
        transcendentals=m * dim,                  # sigmoid
        bytes_accessed=(m_pad * d_pad * wsize
                        + weight_reads * 3 * d_pad * d_pad * wsize
                        + 4 * d_pad * 4
                        + m_pad * d_pad * osize))

    if n_k == 1:
        kernel = _ffn_kernel_resident
        dim_sem = ("parallel",)
        grid_spec = pltpu.PrefetchScalarGridSpec(
            num_scalar_prefetch=0,
            grid=(n_m,),
            in_specs=[
                pl.BlockSpec((tm, d_pad),    lambda i: (i, 0)),   # x row tile
                pl.BlockSpec((d_pad, d_pad), lambda i: (0, 0)),   # w_proj (resident)
                pl.BlockSpec((1, d_pad),     lambda i: (0, 0)),   # b_proj
                pl.BlockSpec((d_pad, d_pad), lambda i: (0, 0)),   # w_gate (resident)
                pl.BlockSpec((1, d_pad),     lambda i: (0, 0)),   # b_gate
                pl.BlockSpec((d_pad, d_pad), lambda i: (0, 0)),   # w2 (resident)
                pl.BlockSpec((1, d_pad),     lambda i: (0, 0)),   # b2
            ],
            out_specs=pl.BlockSpec((tm, d_pad), lambda i: (i, 0)),
        )
    else:
        kernel = _ffn_kernel_ktiled
        dim_sem = ("parallel", "arbitrary")
        grid_spec = pltpu.PrefetchScalarGridSpec(
            num_scalar_prefetch=0,
            grid=(n_m, n_k),
            in_specs=[
                pl.BlockSpec((tm, d_pad), lambda i, k: (i, 0)),   # x row tile
                pl.BlockSpec((d_pad, tk), lambda i, k: (0, k)),   # w_proj cols
                pl.BlockSpec((1, tk),     lambda i, k: (0, k)),   # b_proj
                pl.BlockSpec((d_pad, tk), lambda i, k: (0, k)),   # w_gate cols
                pl.BlockSpec((1, tk),     lambda i, k: (0, k)),   # b_gate
                pl.BlockSpec((tk, d_pad), lambda i, k: (k, 0)),   # w2 rows
                pl.BlockSpec((1, d_pad),  lambda i, k: (0, 0)),   # b2 (resident)
            ],
            out_specs=pl.BlockSpec((tm, d_pad), lambda i, k: (i, 0)),
            scratch_shapes=[pltpu.VMEM((tm, d_pad), jnp.float32)],
        )

    out2d = pl.pallas_call(
        kernel,
        out_shape=jax.ShapeDtypeStruct((m_pad, d_pad), x.dtype),
        grid_spec=grid_spec,
        compiler_params=pltpu.CompilerParams(
            dimension_semantics=dim_sem,
            vmem_limit_bytes=vmem_limit),
        cost_estimate=cost,
    )(x2d, params["w_proj"], params["b_proj"],
      params["w_gate"], params["b_gate"], params["w2"], params["b2"])

    return out2d[:m, :dim].reshape(batch, seq, dim)


# --------------------------------------------------------------------------
# Reference + demo
# --------------------------------------------------------------------------
def _reference_np(x, w1, b1, w2, b2):
    x = np.asarray(x, np.float64)
    w1 = np.asarray(w1, np.float64)
    b1 = np.asarray(b1, np.float64)
    w2 = np.asarray(w2, np.float64)
    b2 = np.asarray(b2, np.float64)
    y = x @ w1.T + b1
    d = x.shape[-1]
    xp, g = y[..., :d], y[..., d:]
    h = xp * (g / (1.0 + np.exp(-g)))
    return h @ w2.T + b2


def _init_linear(key, out_features, in_features):
    kw, kb = jax.random.split(key)
    bound = 1.0 / math.sqrt(in_features)
    w = jax.random.uniform(kw, (out_features, in_features),
                           minval=-bound, maxval=bound, dtype=jnp.float32)
    b = jax.random.uniform(kb, (out_features,),
                           minval=-bound, maxval=bound, dtype=jnp.float32)
    return w, b


def _run_case(key, batch, seq, dim, compute_dtype, atol, vmem_budget_bytes=None):
    k_x, k_l1, k_l2 = jax.random.split(key, 3)
    x = jax.random.normal(k_x, (batch, seq, dim), dtype=jnp.float32)
    w1, b1 = _init_linear(k_l1, 2 * dim, dim)   # SwiGLU proj
    w2, b2 = _init_linear(k_l2, dim, dim)       # final Linear

    params = prepare_ffn_params(w1, b1, w2, b2, compute_dtype=compute_dtype)
    out = jax.block_until_ready(
        feed_forward(x, params, vmem_budget_bytes=vmem_budget_bytes))

    assert out.shape == (batch, seq, dim)
    ref = _reference_np(x, w1, b1, w2, b2)
    err = float(np.max(np.abs(np.asarray(out, np.float64) - ref)))
    assert err < atol, f"mismatch vs reference: max abs err {err}"


if __name__ == "__main__":
    root = jax.random.PRNGKey(0)
    k0, k1, k2 = jax.random.split(root, 3)
    # Small shape matching the module spec (dim=32 -> one 128-lane tile),
    # bf16 compute (default), weight-resident path.
    _run_case(k0, batch=2, seq=8, dim=32, compute_dtype=jnp.bfloat16, atol=5e-2)
    # f32 compute path: exact-semantics check against the fp64 reference.
    _run_case(k1, batch=2, seq=8, dim=32, compute_dtype=jnp.float32, atol=1e-4)
    # Larger shape: 320 rows -> 2 row tiles of 160 (zero M padding, feeds both
    # v7x TensorCores), weights resident, bf16 compute.
    _run_case(k2, batch=2, seq=160, dim=768, compute_dtype=jnp.bfloat16, atol=1e-1)
    # Same data forced through the k-tiled accumulator kernel (small VMEM
    # budget override) to exercise the pl.when init/finalize path.
    _run_case(k2, batch=2, seq=160, dim=768, compute_dtype=jnp.bfloat16, atol=1e-1,
              vmem_budget_bytes=6 * _MB)
    print("KERNEL_OK")
</pallas_src>

<mosaic_0001>
module attributes {stable_mosaic.version = 11 : i64} {
  func.func @_ffn_kernel_resident(%arg0: i32, %arg1: memref<16x128xbf16, #tpu.memory_space<vmem>>, %arg2: memref<128x128xbf16, #tpu.memory_space<vmem>>, %arg3: memref<1x128xf32, #tpu.memory_space<vmem>>, %arg4: memref<128x128xbf16, #tpu.memory_space<vmem>>, %arg5: memref<1x128xf32, #tpu.memory_space<vmem>>, %arg6: memref<128x128xbf16, #tpu.memory_space<vmem>>, %arg7: memref<1x128xf32, #tpu.memory_space<vmem>>, %arg8: memref<16x128xf32, #tpu.memory_space<vmem>>) attributes {dimension_semantics = [#tpu.dimension_semantics<parallel>], iteration_bounds = array<i64: 1>, scalar_prefetch = 0 : i64, scratch_operands = 0 : i64, tpu.core_type = #tpu.core_type<tc>, window_params = [{transform_indices = @transform_0, window_bounds = array<i64: 16, 128>}, {pipeline_mode = #tpu.pipeline_mode<synchronous>, transform_indices = @transform_1, window_bounds = array<i64: 128, 128>}, {pipeline_mode = #tpu.pipeline_mode<synchronous>, transform_indices = @transform_2, window_bounds = array<i64: 1, 128>}, {pipeline_mode = #tpu.pipeline_mode<synchronous>, transform_indices = @transform_3, window_bounds = array<i64: 128, 128>}, {pipeline_mode = #tpu.pipeline_mode<synchronous>, transform_indices = @transform_4, window_bounds = array<i64: 1, 128>}, {pipeline_mode = #tpu.pipeline_mode<synchronous>, transform_indices = @transform_5, window_bounds = array<i64: 128, 128>}, {pipeline_mode = #tpu.pipeline_mode<synchronous>, transform_indices = @transform_6, window_bounds = array<i64: 1, 128>}, {transform_indices = @transform_7, window_bounds = array<i64: 16, 128>}]} {
    %c0 = arith.constant 0 : index
    %c0_0 = arith.constant 0 : index
    %0 = vector.load %arg1[%c0, %c0_0] : memref<16x128xbf16, #tpu.memory_space<vmem>>, vector<16x128xbf16>
    %c0_1 = arith.constant 0 : index
    %c0_2 = arith.constant 0 : index
    %1 = vector.load %arg2[%c0_1, %c0_2] : memref<128x128xbf16, #tpu.memory_space<vmem>>, vector<128x128xbf16>
    %cst = arith.constant dense<0.000000e+00> : vector<16x128xf32>
    %2 = tpu.matmul %0, %1, %cst {dimension_numbers = #tpu.dot_dimension_numbers<[1], [0], [0], [1], [0, 0, 1, 1], [], []>} : vector<16x128xbf16>, vector<128x128xbf16>, vector<16x128xf32> -> vector<16x128xf32>
    %c0_3 = arith.constant 0 : index
    %c0_4 = arith.constant 0 : index
    %3 = vector.load %arg3[%c0_3, %c0_4] : memref<1x128xf32, #tpu.memory_space<vmem>>, vector<1x128xf32>
    %4 = vector.broadcast %3 : vector<1x128xf32> to vector<16x128xf32>
    %5 = arith.addf %2, %4 : vector<16x128xf32>
    %c0_5 = arith.constant 0 : index
    %c0_6 = arith.constant 0 : index
    %6 = vector.load %arg4[%c0_5, %c0_6] : memref<128x128xbf16, #tpu.memory_space<vmem>>, vector<128x128xbf16>
    %cst_7 = arith.constant dense<0.000000e+00> : vector<16x128xf32>
    %7 = tpu.matmul %0, %6, %cst_7 {dimension_numbers = #tpu.dot_dimension_numbers<[1], [0], [0], [1], [0, 0, 1, 1], [], []>} : vector<16x128xbf16>, vector<128x128xbf16>, vector<16x128xf32> -> vector<16x128xf32>
    %c0_8 = arith.constant 0 : index
    %c0_9 = arith.constant 0 : index
    %8 = vector.load %arg5[%c0_8, %c0_9] : memref<1x128xf32, #tpu.memory_space<vmem>>, vector<1x128xf32>
    %9 = vector.broadcast %8 : vector<1x128xf32> to vector<16x128xf32>
    %10 = arith.addf %7, %9 : vector<16x128xf32>
    %11 = arith.negf %10 : vector<16x128xf32>
    %12 = math.exp %11 : vector<16x128xf32>
    %cst_10 = arith.constant 1.000000e+00 : f32
    %13 = vector.broadcast %cst_10 : f32 to vector<16x128xf32>
    %14 = arith.addf %13, %12 : vector<16x128xf32>
    %15 = arith.divf %13, %14 : vector<16x128xf32>
    %16 = arith.mulf %10, %15 : vector<16x128xf32>
    %17 = arith.mulf %5, %16 : vector<16x128xf32>
    %18 = arith.truncf %17 : vector<16x128xf32> to vector<16x128xbf16>
    %c0_11 = arith.constant 0 : index
    %c0_12 = arith.constant 0 : index
    %19 = vector.load %arg6[%c0_11, %c0_12] : memref<128x128xbf16, #tpu.memory_space<vmem>>, vector<128x128xbf16>
    %cst_13 = arith.constant dense<0.000000e+00> : vector<16x128xf32>
    %20 = tpu.matmul %18, %19, %cst_13 {dimension_numbers = #tpu.dot_dimension_numbers<[1], [0], [0], [1], [0, 0, 1, 1], [], []>} : vector<16x128xbf16>, vector<128x128xbf16>, vector<16x128xf32> -> vector<16x128xf32>
    %c0_14 = arith.constant 0 : index
    %c0_15 = arith.constant 0 : index
    %21 = vector.load %arg7[%c0_14, %c0_15] : memref<1x128xf32, #tpu.memory_space<vmem>>, vector<1x128xf32>
    %22 = vector.broadcast %21 : vector<1x128xf32> to vector<16x128xf32>
    %23 = arith.addf %20, %22 : vector<16x128xf32>
    %c0_16 = arith.constant 0 : index
    %c0_17 = arith.constant 0 : index
    %24 = vector.load %arg8[%c0_16, %c0_17] : memref<16x128xf32, #tpu.memory_space<vmem>>, vector<16x128xf32>
    tpu.vector_store %arg8[%c0_16, %c0_17], %23 {strides = array<i32>} : memref<16x128xf32, #tpu.memory_space<vmem>>, vector<16x128xf32>,
    return
  }
  func.func @transform_0(%arg0: i32) -> (i32, i32) {
    %c0_i32 = arith.constant 0 : i32
    %c0_i32_0 = arith.constant 0 : i32
    return %arg0, %c0_i32 : i32, i32
  }
  func.func @transform_1(%arg0: i32) -> (i32, i32) {
    %c0_i32 = arith.constant 0 : i32
    %c0_i32_0 = arith.constant 0 : i32
    %c0_i32_1 = arith.constant 0 : i32
    return %c0_i32, %c0_i32_0 : i32, i32
  }
  func.func @transform_2(%arg0: i32) -> (i32, i32) {
    %c0_i32 = arith.constant 0 : i32
    %c0_i32_0 = arith.constant 0 : i32
    %c0_i32_1 = arith.constant 0 : i32
    return %c0_i32, %c0_i32_0 : i32, i32
  }
  func.func @transform_3(%arg0: i32) -> (i32, i32) {
    %c0_i32 = arith.constant 0 : i32
    %c0_i32_0 = arith.constant 0 : i32
    %c0_i32_1 = arith.constant 0 : i32
    return %c0_i32, %c0_i32_0 : i32, i32
  }
  func.func @transform_4(%arg0: i32) -> (i32, i32) {
    %c0_i32 = arith.constant 0 : i32
    %c0_i32_0 = arith.constant 0 : i32
    %c0_i32_1 = arith.constant 0 : i32
    return %c0_i32, %c0_i32_0 : i32, i32
  }
  func.func @transform_5(%arg0: i32) -> (i32, i32) {
    %c0_i32 = arith.constant 0 : i32
    %c0_i32_0 = arith.constant 0 : i32
    %c0_i32_1 = arith.constant 0 : i32
    return %c0_i32, %c0_i32_0 : i32, i32
  }
  func.func @transform_6(%arg0: i32) -> (i32, i32) {
    %c0_i32 = arith.constant 0 : i32
    %c0_i32_0 = arith.constant 0 : i32
    %c0_i32_1 = arith.constant 0 : i32
    return %c0_i32, %c0_i32_0 : i32, i32
  }
  func.func @transform_7(%arg0: i32) -> (i32, i32) {
    %c0_i32 = arith.constant 0 : i32
    %c0_i32_0 = arith.constant 0 : i32
    return %arg0, %c0_i32 : i32, i32
  }
}

</mosaic_0001>

<bundles_post_ra>
// kernel: tpu_custom_call.1
= control target key start
LH: loop header
LB: loop body
LE: loop exit
PB: predicated region body
PF: predicated region fallthrough
CT: control target
= control target key end

     0   :  { %12 = vsyncpa [#allocation3], 0  ;;  %s920_s0 = inlined_call_operand.hbm [shape: bf16[16,128], index: 0, kind: input, shape index: {}]   ;;  %s921_s1 = inlined_call_operand.hbm [shape: bf16[128,128], index: 1, kind: input, shape index: {}]   ;;  %s922_s2 = inlined_call_operand.vmem [shape: f32[1,128], index: 2, kind: input, shape index: {}]   ;;  %s923_s3 = inlined_call_operand.hbm [shape: bf16[128,128], index: 3, kind: input, shape index: {}]   ;;  %s924_s4 = inlined_call_operand.vmem [shape: f32[1,128], index: 4, kind: input, shape index: {}]   ;;  %s925_s5 = inlined_call_operand.hbm [shape: bf16[128,128], index: 5, kind: input, shape index: {}]   ;;  %s926_s6 = inlined_call_operand.vmem [shape: f32[1,128], index: 6, kind: input, shape index: {}]   ;;  %s927_s7 = inlined_call_operand.hbm [shape: f32[16,128], index: 7, kind: output, shape index: {}]  }
   0x1   :  { %13 = vsyncpa [#allocation6], 0 }
   0x2   :  { %14 = vsyncpa [#allocation9], 0 }
   0x3   :  { %15 = vsyncpa [#allocation4], 0  ;;  %s744_s24 = smov [#allocation5]   ;;  %s745_s26 = smov [#allocation2]  }
   0x4   :  { %s33_s25 = sshll.u32 %s744_s24, 4  ;;  %s21_s27 = sshll.u32 %s745_s26, 4  ;;  %s34_s25 = int_to_ptr.vmem [resolvable:$true] %s33_s25  ;;  %s795_s27 = int_to_ptr.vmem [resolvable:$true] %s21_s27 }
   0x5   :  { %s626_s30 = scalar_lea.hbm %s921_s1, 1024 }
   0x6   :  { %p627_p0 = scmp.ne.s32.totalorder %s921_s1, %s626_s30  ;;  %p630_p1 = scmp.lt.u32.totalorder %s626_s30, %s921_s1 }
   0x8   :  { %p632_p2 = pnand %p630_p1, %p627_p0 }
   0xa   :  { %635 = shalt.err (!%p632_p2)
}
   0xb   :  { %s636_s12 = scalar_lea.vmem %s34_s25, 1024  ;;  %p641_p4 = scmp.lt.s32.totalorder %s34_s25, %s34_s25 }
   0xc   :  { %p637_p3 = scmp.ne.s32.totalorder %s34_s25, %s636_s12  ;;  %p642_p5 = scmp.lt.s32.totalorder %s636_s12, %s636_s12 }
   0xe   :  { %p643_p6 = por %p642_p5, %p641_p4 }
  0x10   :  { %p644_p7 = pnand %p643_p6, %p637_p3 }
  0x12   :  { %647 = shalt.err (!%p644_p7)
}
  0x13   :  { %s746_s13 = smov 64   ;;  %s747_s14 = smov 4  }
  0x14   :  { %39 = dma.hbm_to_vmem [thread:$0]  %s921_s1, 1024, %s34_s25, [#allocation6], %s746_s13, %s746_s13, %s747_s14  }
  0x15   :  { %s648_s19 = scalar_lea.hbm %s920_s0, 128 }
  0x16   :  { %p649_p8 = scmp.ne.s32.totalorder %s920_s0, %s648_s19  ;;  %p652_p9 = scmp.lt.u32.totalorder %s648_s19, %s920_s0 }
  0x18   :  { %p654_p10 = pnand %p652_p9, %p649_p8 }
  0x1a   :  { %657 = shalt.err (!%p654_p10)
}
  0x1b   :  { %s658_s24 = scalar_lea.vmem %s795_s27, 128  ;;  %p663_p12 = scmp.lt.s32.totalorder %s795_s27, %s795_s27 }
  0x1c   :  { %p659_p11 = scmp.ne.s32.totalorder %s795_s27, %s658_s24  ;;  %p664_p13 = scmp.lt.s32.totalorder %s658_s24, %s658_s24 }
  0x1e   :  { %p665_p0 = por %p664_p13, %p663_p12 }
  0x20   :  { %p666_p1 = pnand %p665_p0, %p659_p11 }
  0x22   :  { %669 = shalt.err (!%p666_p1)
}
  0x23   :  { %27 = dma.hbm_to_vmem [thread:$0]  %s920_s0, 128, %s795_s27, [#allocation3], %s746_s13, %s746_s13, %s747_s14  }
  0x24   :  { %s748_s26 = smov [#allocation7]   ;;  %s749_s29 = smov [#allocation8]  }
  0x25   :  { %s47_s28 = sshll.u32 %s748_s26, 4  ;;  %s61_s30 = sshll.u32 %s749_s29, 4  ;;  %s48_s28 = int_to_ptr.vmem [resolvable:$true] %s47_s28  ;;  %s832_s30 = int_to_ptr.vmem [resolvable:$true] %s61_s30 }
  0x26   :  { %s670_s10 = scalar_lea.hbm %s923_s3, 1024 }
  0x27   :  { %p671_p2 = scmp.ne.s32.totalorder %s923_s3, %s670_s10  ;;  %p674_p3 = scmp.lt.u32.totalorder %s670_s10, %s923_s3 }
  0x29   :  { %p676_p4 = pnand %p674_p3, %p671_p2 }
  0x2b   :  { %679 = shalt.err (!%p676_p4)
}
  0x2c   :  { %s680_s0 = scalar_lea.vmem %s48_s28, 1024  ;;  %p685_p6 = scmp.lt.s32.totalorder %s48_s28, %s48_s28 }
  0x2d   :  { %p681_p5 = scmp.ne.s32.totalorder %s48_s28, %s680_s0  ;;  %p686_p7 = scmp.lt.s32.totalorder %s680_s0, %s680_s0 }
  0x2f   :  { %p687_p8 = por %p686_p7, %p685_p6 }
  0x31   :  { %p688_p9 = pnand %p687_p8, %p681_p5 }
  0x33   :  { %691 = shalt.err (!%p688_p9)
}
  0x34   :  { %53 = dma.hbm_to_vmem [thread:$0]  %s923_s3, 1024, %s48_s28, [#allocation6], %s746_s13, %s746_s13, %s747_s14  }
  0x35   :  { %s692_s20 = scalar_lea.hbm %s925_s5, 1024 }
  0x36   :  { %p693_p10 = scmp.ne.s32.totalorder %s925_s5, %s692_s20  ;;  %p696_p11 = scmp.lt.u32.totalorder %s692_s20, %s925_s5 }
  0x38   :  { %p698_p12 = pnand %p696_p11, %p693_p10 }
  0x3a   :  { %701 = shalt.err (!%p698_p12)
}
  0x3b   :  { %s702_s1 = scalar_lea.vmem %s832_s30, 1024  ;;  %p707_p0 = scmp.lt.s32.totalorder %s832_s30, %s832_s30 }
  0x3c   :  { %p703_p13 = scmp.ne.s32.totalorder %s832_s30, %s702_s1  ;;  %p708_p1 = scmp.lt.s32.totalorder %s702_s1, %s702_s1 }
  0x3e   :  { %p709_p2 = por %p708_p1, %p707_p0 }
  0x40   :  { %p710_p3 = pnand %p709_p2, %p703_p13 }
  0x42   :  { %713 = shalt.err (!%p710_p3)
}
  0x43   :  { %67 = dma.hbm_to_vmem [thread:$0]  %s925_s5, 1024, %s832_s30, [#allocation9], %s746_s13, %s746_s13, %s747_s14  }
  0x44   :  { %736 = dma.done.wait [#allocation3], 128  }
  0x45   :  { %737 = vsyncadd [#allocation3], 4294967168 }
  0x46   :  { %738 = dma.done.wait [#allocation6], 2048  }
  0x47   :  { %739 = vsyncadd [#allocation6], 4294965248 }
  0x48   :  { %740 = dma.done.wait [#allocation9], 1024  }
  0x49   :  { %741 = vsyncadd [#allocation9], 4294966272  ;;  %v750_v0 = vmov 0.0   ;;  %vm751_vm0 = vmmov 0   ;;  %v593_v1 = vld [vmem:[#allocation7] sm:$0xff]   ;;  %v594_v2 = vld [vmem:[#allocation7 + $0x8] sm:$0xff]  }
  0x4a   :  { %542 = vmatprep.subr.bf16.mxu1 %v750_v0  ;;  %522 = vmatprep.subr.bf16.mxu0 %v750_v0  ;;  %v595_v3 = vld [vmem:[#allocation7 + $0x10] sm:$0xff]   ;;  %v600_v4 = vld [vmem:[#allocation5] sm:$0xff]   ;;  %v602_v5 = vld [vmem:[#allocation5 + $0x8] sm:$0xff]   ;;  %s752_s29 = smov [#allocation10]  }
  0x4b   :  { %558 = vmatprep.mubr.msk.bf16.mxu1 %vm751_vm0, %v750_v0  ;;  %538 = vmatprep.mubr.msk.bf16.mxu0 %vm751_vm0, %v750_v0  ;;  %v596_v6 = vld [vmem:[#allocation7 + $0x18] sm:$0xff]   ;;  %v604_v7 = vld [vmem:[#allocation5 + $0x10] sm:$0xff]   ;;  %v597_v8 = vld [vmem:[#allocation7 + $0x20] sm:$0xff]   ;;  %s451_s30 = sshll.u32 %s752_s29, 4  ;;  %s452_s30 = int_to_ptr.vmem [resolvable:$true] %s451_s30 }
  0x4c   :  { %543 = vmatpush3.bf16.msra.mxu1 %v593_v1  ;;  %523 = vmatpush3.bf16.msra.mxu0 %v600_v4  ;;  %v598_v9 = vld [vmem:[#allocation7 + $0x28] sm:$0xff]   ;;  %v605_v10 = vld [vmem:[#allocation5 + $0x18] sm:$0xff]   ;;  %v606_v11 = vld [vmem:[#allocation5 + $0x20] sm:$0xff]   ;;  %p719_p5 = scmp.lt.s32.totalorder %s452_s30, %s452_s30 }
  0x4d   :  { %544 = vmatprep.subr.bf16.mxu1 %v750_v0  ;;  %524 = vmatprep.subr.bf16.mxu0 %v750_v0  ;;  %v599_v12 = vld [vmem:[#allocation7 + $0x30] sm:$0xff]   ;;  %v607_v13 = vld [vmem:[#allocation5 + $0x28] sm:$0xff]   ;;  %v601_v14 = vld [vmem:[#allocation7 + $0x38] sm:$0xff]  }
  0x4e   :  { %v603_v15 = vld [vmem:[#allocation2] sm:$0xff]   ;;  %v608_v16 = vld [vmem:[#allocation5 + $0x30] sm:$0xff]   ;;  %v610_v18 = vld [vmem:[#allocation8] sm:$0xff]  }
  0x4f   :  { %v609_v17 = vld [vmem:[#allocation5 + $0x38] sm:$0xff]   ;;  %v611_v19 = vld [vmem:[#allocation8 + $0x8] sm:$0xff]   ;;  %v612_v20 = vld [vmem:[#allocation8 + $0x10] sm:$0xff]  }
  0x50   :  { %545 = vmatpush3.bf16.msra.mxu1 %v594_v2  ;;  %525 = vmatpush3.bf16.msra.mxu0 %v602_v5  ;;  %v613_v21 = vld [vmem:[#allocation8 + $0x18] sm:$0xff]   ;;  %v614_v22 = vld [vmem:[#allocation8 + $0x20] sm:$0xff]   ;;  %v615_v23 = vld [vmem:[#allocation8 + $0x28] sm:$0xff]  }
  0x51   :  { %546 = vmatprep.subr.bf16.mxu1 %v750_v0  ;;  %526 = vmatprep.subr.bf16.mxu0 %v750_v0  ;;  %v616_v24 = vld [vmem:[#allocation8 + $0x30] sm:$0xff]   ;;  %v617_v25 = vld [vmem:[#allocation8 + $0x38] sm:$0xff]  }
  0x52   :  { %v475_v26 = vld [vmem:[%s924_s4] ss:$0 sm:$0xff] }
  0x53   :  { %v465_v43 = vld [vmem:[%s922_s2] ss:$0 sm:$0xff]  ;;  %s714_s2 = scalar_lea.vmem %s452_s30, 256 }
  0x54   :  { %547 = vmatpush3.bf16.msra.mxu1 %v595_v3  ;;  %527 = vmatpush3.bf16.msra.mxu0 %v604_v7  ;;  %v486_v53 = vld [vmem:[%s926_s6] ss:$0 sm:$0xff]  ;;  %p715_p4 = scmp.ne.s32.totalorder %s452_s30, %s714_s2  ;;  %p720_p6 = scmp.lt.s32.totalorder %s714_s2, %s714_s2 }
  0x55   :  { %548 = vmatprep.subr.bf16.mxu1 %v750_v0  ;;  %528 = vmatprep.subr.bf16.mxu0 %v750_v0 }
  0x56   :  { %p721_p7 = por %p720_p6, %p719_p5 }
  0x58   :  { %549 = vmatpush3.bf16.msra.mxu1 %v596_v6  ;;  %529 = vmatpush3.bf16.msra.mxu0 %v605_v10  ;;  %p722_p8 = pnand %p721_p7, %p715_p4 }
  0x59   :  { %550 = vmatprep.subr.bf16.mxu1 %v750_v0  ;;  %530 = vmatprep.subr.bf16.mxu0 %v750_v0 }
  0x5c   :  { %551 = vmatpush3.bf16.msra.mxu1 %v597_v8  ;;  %531 = vmatpush3.bf16.msra.mxu0 %v606_v11 }
  0x5d   :  { %552 = vmatprep.subr.bf16.mxu1 %v750_v0  ;;  %532 = vmatprep.subr.bf16.mxu0 %v750_v0 }
  0x60   :  { %553 = vmatpush3.bf16.msra.mxu1 %v598_v9  ;;  %533 = vmatpush3.bf16.msra.mxu0 %v607_v13 }
  0x61   :  { %554 = vmatprep.subr.bf16.mxu1 %v750_v0  ;;  %534 = vmatprep.subr.bf16.mxu0 %v750_v0 }
  0x64   :  { %555 = vmatpush3.bf16.msra.mxu1 %v599_v12  ;;  %535 = vmatpush3.bf16.msra.mxu0 %v608_v16 }
  0x65   :  { %556 = vmatprep.subr.bf16.mxu1 %v750_v0  ;;  %536 = vmatprep.subr.bf16.mxu0 %v750_v0 }
  0x68   :  { %557 = vmatpush3.bf16.msra.mxu1 %v601_v14  ;;  %537 = vmatpush3.bf16.msra.mxu0 %v609_v17 }
  0x69   :  { %562 = vmatprep.subr.bf16.mxu0 %v750_v0 }
  0x6b   :  { %559 = vmatmul.mubr.bf16.vlgmr.msra.gmra.mrb[0].mxu1 %v603_v15  ;;  %539 = vmatmul.mubr.bf16.vlgmr.msra.gmra.mrb[0].mxu0 %v603_v15 }
  0x6c   :  { %578 = vmatprep.mubr.msk.bf16.mxu0 %vm751_vm0, %v750_v0  ;;  %563 = vmatpush3.bf16.msra.mxu0 %v610_v18 }
  0x6d   :  { %564 = vmatprep.subr.bf16.mxu0 %v750_v0 }
  0x70   :  { %565 = vmatpush3.bf16.msra.mxu0 %v611_v19 }
  0x71   :  { %566 = vmatprep.subr.bf16.mxu0 %v750_v0 }
  0x74   :  { %567 = vmatpush3.bf16.msra.mxu0 %v612_v20 }
  0x75   :  { %568 = vmatprep.subr.bf16.mxu0 %v750_v0 }
  0x78   :  { %569 = vmatpush3.bf16.msra.mxu0 %v613_v21 }
  0x79   :  { %570 = vmatprep.subr.bf16.mxu0 %v750_v0 }
  0x7c   :  { %571 = vmatpush3.bf16.msra.mxu0 %v614_v22 }
  0x7d   :  { %572 = vmatprep.subr.bf16.mxu0 %v750_v0 }
  0x80   :  { %573 = vmatpush3.bf16.msra.mxu0 %v615_v23 }
  0x81   :  { %574 = vmatprep.subr.bf16.mxu0 %v750_v0 }
  0x84   :  { %575 = vmatpush3.bf16.msra.mxu0 %v616_v24 }
  0x85   :  { %576 = vmatprep.subr.bf16.mxu0 %v750_v0 }
  0x88   :  { %577 = vmatpush3.bf16.msra.mxu0 %v617_v25 }
 0x13e   :  { %v308_v27 = vpop.f32.mrb[0].mxu1  ;;  %v196_v35 = vpop.f32.mrb[0].mxu0 }
 0x13f   :  { %v309_v28 = vadd.f32 %v475_v26, %v308_v27  ;;  %v560_v29 = vpop.f32.mrb[1].mxu1  ;;  %v540_v36 = vpop.f32.mrb[1].mxu0  ;;  %v197_v44 = vadd.f32 %v465_v43, %v196_v35 }
 0x140   :  { %v311_v30 = vpop.f32.mrb[2].mxu1  ;;  %v199_v37 = vpop.f32.mrb[2].mxu0 }
 0x141   :  { %v484_v31 = vmul.f32 -1.442695, %v309_v28  ;;  %v312_v32 = vadd.f32 %v475_v26, %v311_v30  ;;  %v561_v33 = vpop.f32.mrb[3].mxu1  ;;  %v541_v38 = vpop.f32.mrb[3].mxu0  ;;  %v200_v50 = vadd.f32 %v465_v43, %v199_v37 }
 0x143   :  { %618 = vpow2.f32 %v484_v31  ;;  %v485_v34 = vmul.f32 -1.442695, %v312_v32 }
 0x145   :  { %620 = vpow2.f32 %v485_v34 }
 0x14d   :  { %v619_v39 = vpop.eup %618 }
 0x14e   :  { %v321_v40 = vadd.f32 1.0, %v619_v39 }
 0x14f   :  { %v621_v41 = vpop.eup %620 }
 0x150   :  { %622 = vrcp.f32 %v321_v40  ;;  %v322_v42 = vadd.f32 1.0, %v621_v41 }
 0x152   :  { %624 = vrcp.f32 %v322_v42 }
 0x15a   :  { %v623_v45 = vpop.eup %622 }
 0x15b   :  { %v327_v46 = vmul.f32 %v623_v45, %v309_v28 }
 0x15c   :  { %v625_v47 = vpop.eup %624 }
 0x15d   :  { %v328_v48 = vmul.f32 %v625_v47, %v312_v32  ;;  %v329_v49 = vmul.f32 %v327_v46, %v197_v44 }
 0x15f   :  { %v330_v51 = vmul.f32 %v328_v48, %v200_v50 }
 0x161   :  { %v331_v52 = vpack.c.bf16 %v330_v51, %v329_v49 }
 0x163   :  { %579 = vmatmul.mubr.bf16.vlgmr.msra.gmra.mrb[4].mxu0 %v331_v52 }
 0x236   :  { %v437_v54 = vpop.f32.mrb[4].mxu0 }
 0x237   :  { %v438_v55 = vadd.f32 %v486_v53, %v437_v54  ;;  %v580_v56 = vpop.f32.mrb[5].mxu0 }
 0x238   :  { %v440_v57 = vpop.f32.mrb[6].mxu0 }
 0x239   :  { %444 = vst [vmem:[#allocation10] sm:$0xff] %v438_v55  ;;  %v441_v58 = vadd.f32 %v486_v53, %v440_v57  ;;  %v581_v59 = vpop.f32.mrb[7].mxu0 }
 0x23b   :  { %445 = vst [vmem:[#allocation10 + $0x8] sm:$0xff] %v441_v58 }
 0x23c   :  { %725 = shalt.err (!%p722_p8)
}
 0x23d   :  { %s726_s9 = scalar_lea.hbm %s927_s7, 256 }
 0x23e   :  { %p727_p9 = scmp.ne.s32.totalorder %s927_s7, %s726_s9  ;;  %p730_p10 = scmp.lt.u32.totalorder %s726_s9, %s927_s7 }
 0x240   :  { %p732_p11 = pnand %p730_p10, %p727_p9 }
 0x242   :  { %735 = shalt.err (!%p732_p11)
}
 0x243   :  { %s753_s16 = smov 128   ;;  %s754_s0 = smov 8  }
 0x244   :  { %457 = dma.vmem_to_hbm [thread:$0]  %s452_s30, 256, %s927_s7, [#allocation4], %s753_s16, %s753_s16, %s754_s0  }
 0x245   :  { %742 = dma.done.wait [#allocation4], 256  }
 0x246   :  { %743 = vsyncadd [#allocation4], 4294967040 }
 0x247   :  { %461 = vsyncpa [#allocation3], 1 }
 0x248   :  { %462 = vsyncpa [#allocation6], 1 }
 0x249   :  { %463 = vsyncpa [#allocation9], 1 }
 0x24a   :  { %464 = vsyncpa [#allocation4], 1 }

</bundles_post_ra>
